<compile_context>
chip_gen: v7x
topology: tpu7x:2x2x1
jax: 0.10.0
libtpu: 0.0.40
codegen_flags: <defaults>
</compile_context>

<pallas_src>
import functools

import jax
import jax.numpy as jnp
from jax.experimental import pallas as pl
from jax.experimental.pallas import tpu as pltpu


def _psi_kernel(sel_ref, x_ref, o_ref, *, bl, w, new_w, n_parts):
    """One grid step.

    sel_ref: (w, bl*new_w) bf16 lane-permutation matrix (constant block index ->
             fetched once, VMEM-resident).
    x_ref:   (bb, th, bl*w)   bb samples x th rows of the merged (d*new_h) axis;
             lanes hold (i, w) where i is the h-phase.
    o_ref:   (bb, bl*bl, th, new_w)
    """
    bb, th = x_ref.shape[0], x_ref.shape[1]
    sel = sel_ref[...]                                   # resident, cheap vreg load

    for i in range(bl):
        # h-phase i: static lane slice (a non-128-aligned offset costs at most one
        # XLU shift per vreg, absorbed by the mem-bound budget).
        slab = x_ref[:, :, i * w:(i + 1) * w]            # (bb, th, w)
        slab2 = slab.reshape(bb * th, w)                 # free: bb == 1 or th % 8 == 0

        if n_parts == 1:
            # bf16: one native bf16 MXU pass; x*1.0 (+ exact zeros) accumulated in
            # f32 and rounded back to bf16 reproduces x exactly.
            y = jnp.dot(slab2, sel, preferred_element_type=jnp.bfloat16)
        else:
            # f32: exact 3-way bf16 split (p0 + p1 + p2 == x for normal finite x),
            # each pass is x_part * 1.0 accumulated in f32 -> bit-exact sum.
            p0 = slab2.astype(jnp.bfloat16)
            r1 = slab2 - p0.astype(jnp.float32)
            p1 = r1.astype(jnp.bfloat16)
            r2 = r1 - p1.astype(jnp.float32)
            p2 = r2.astype(jnp.bfloat16)
            y = (jnp.dot(p0, sel, preferred_element_type=jnp.float32)
                 + jnp.dot(p1, sel, preferred_element_type=jnp.float32)
                 + jnp.dot(p2, sel, preferred_element_type=jnp.float32))

        for j in range(bl):
            g = i * bl + j
            yj = y[:, j * new_w:(j + 1) * new_w]         # (bb*th, new_w)
            o_ref[:, g:g + 1, :, :] = (
                yj.astype(o_ref.dtype).reshape(bb, 1, th, new_w))


def _pick_tiling(bs, M, row_bytes, target_bytes, min_steps=8):
    """Pick (samples per block b_blk, rows of the merged (d*new_h) axis per block).

    Blocks are sized toward `target_bytes` while keeping >= `min_steps` grid steps
    (double-buffering + v7x megacore sharding).  Every candidate keeps BlockSpec
    dims either a multiple of 8 or the full axis: no ragged blocks, no relayouts.
    """
    if M % 8 == 0:
        th_cands = [t for t in range(8, M + 1, 8) if M % t == 0]
    else:
        th_cands = [M]                         # full axis (rare; small shapes)
    b_cands = [b for b in range(1, bs + 1) if bs % b == 0]

    best_key, best = None, (1, th_cands[0])
    for b_blk in b_cands:
        for th in th_cands:
            if b_blk > 1 and (th != M or M % 8 != 0):
                continue                       # multi-sample blocks: whole, 8-aligned samples only
            blk = b_blk * th * row_bytes
            steps = (bs // b_blk) * (M // th)
            fits = blk <= target_bytes
            key = (fits, steps >= min_steps, blk if fits else -blk)
            if best_key is None or key > best_key:
                best_key, best = key, (b_blk, th)
    return best


@functools.partial(jax.jit, static_argnames=("block_size", "max_block_bytes"))
def psi_forward(x, block_size, max_block_bytes=4 * 1024 * 1024):
    """Pallas TPU implementation of psi.forward (space-to-depth), NCHW in / out."""
    bl = int(block_size)
    bs, d, h, w = x.shape
    if bl == 1:
        return x
    assert h % bl == 0 and w % bl == 0, "spatial dims must be divisible by block_size"
    new_h, new_w = h // bl, w // bl

    if x.dtype == jnp.dtype(jnp.bfloat16):
        n_parts = 1
    elif x.dtype == jnp.dtype(jnp.float32):
        n_parts = 3
    else:
        raise NotImplementedError("psi_forward Pallas kernel supports f32 / bf16 inputs")

    itemsize = x.dtype.itemsize
    M = d * new_h                               # merged (channel, new_h) row axis
    row_bytes = bl * w * itemsize
    b_blk, th = _pick_tiling(bs, M, row_bytes, int(max_block_bytes))
    n_b, n_t = bs // b_blk, M // th
    block_bytes = b_blk * th * row_bytes
    vmem_limit = int(min(64 << 20, max(32 << 20, 5 * block_bytes + (2 << 20))))

    # Lane-permutation matrix, built once per call and kept VMEM-resident:
    # sel[src, j*new_w + k] = 1  iff  src == k*bl + j.
    col = jnp.arange(bl * new_w, dtype=jnp.int32)
    src = (col % new_w) * bl + (col // new_w)
    sel = (jnp.arange(w, dtype=jnp.int32)[:, None] == src[None, :]).astype(jnp.bfloat16)

    # Metadata-only view: split h -> (new_h, bl), merge (d, new_h) and (bl, w).
    x_view = x.reshape(bs, M, bl * w)

    flops = 2 * n_parts * w * x.size            # fused lane-permutation matmuls
    bytes_accessed = 2 * x.size * itemsize + sel.size * 2

    out = pl.pallas_call(
        functools.partial(_psi_kernel, bl=bl, w=w, new_w=new_w, n_parts=n_parts),
        out_shape=jax.ShapeDtypeStruct((bs, bl * bl, M, new_w), x.dtype),
        grid_spec=pltpu.PrefetchScalarGridSpec(
            num_scalar_prefetch=0,
            grid=(n_b, n_t),
            in_specs=[
                pl.BlockSpec((w, bl * new_w), lambda b, t: (0, 0)),       # resident
                pl.BlockSpec((b_blk, th, bl * w), lambda b, t: (b, t, 0)),
            ],
            out_specs=pl.BlockSpec((b_blk, bl * bl, th, new_w),
                                   lambda b, t: (b, 0, t, 0)),
        ),
        compiler_params=pltpu.CompilerParams(
            dimension_semantics=("parallel", "parallel"),
            vmem_limit_bytes=vmem_limit,
        ),
        cost_estimate=pl.CostEstimate(
            flops=int(flops), transcendentals=0, bytes_accessed=int(bytes_accessed)),
    )(sel, x_view)

    # Metadata-only: (bs, bl*bl, d*new_h, new_w) -> (bs, bl*bl*d, new_h, new_w).
    return out.reshape(bs, bl * bl * d, new_h, new_w)


def psi_reference(x, bl):
    """Pure-JAX mirror of the PyTorch psi.forward (NCHW)."""
    bs, d, h, w = x.shape
    new_h, new_w = h // bl, w // bl
    y = x.reshape(bs, d, new_h, bl, new_w, bl)
    y = jnp.transpose(y, (0, 3, 5, 1, 2, 4))
    return y.reshape(bs, d * bl * bl, new_h, new_w)


# TODO(synk): psi.inverse (depth-to-space) and the rest of the iRevNet forward
# (convs / BatchNorm / ReLU / dropout / avg-pool / linear / injective_pad) have no
# bespoke Pallas implementation here and stay in plain XLA.

if __name__ == "__main__":
    bl = 2

    def check(shape, dtype):
        x = jax.random.normal(jax.random.PRNGKey(0), shape,
                              dtype=jnp.float32).astype(dtype)
        out = jax.block_until_ready(psi_forward(x, block_size=bl))
        ref = psi_reference(x, bl)
        assert out.shape == ref.shape and out.dtype == x.dtype
        assert jnp.array_equal(out, ref), f"psi mismatch for {shape} {dtype}"

    check((2, 4, 16, 16), jnp.float32)    # tiled merged-row grid (2, 4), f32 exact split
    check((2, 4, 16, 16), jnp.bfloat16)   # single native bf16 MXU pass
    check((2, 3, 64, 48), jnp.float32)    # odd channel count, non-128-aligned lane slices
    check((16, 3, 16, 16), jnp.float32)   # multi-sample blocks (b_blk > 1)

    print("KERNEL_OK")
</pallas_src>

<mosaic_0001>
module attributes {stable_mosaic.version = 11 : i64} {
  func.func @_psi_kernel(%arg0: i32, %arg1: i32, %arg2: memref<16x16xbf16, #tpu.memory_space<vmem>>, %arg3: memref<1x8x32xf32, #tpu.memory_space<vmem>>, %arg4: memref<1x4x8x8xf32, #tpu.memory_space<vmem>>) attributes {dimension_semantics = [#tpu.dimension_semantics<parallel>, #tpu.dimension_semantics<parallel>], iteration_bounds = array<i64: 2, 4>, scalar_prefetch = 0 : i64, scratch_operands = 0 : i64, tpu.core_type = #tpu.core_type<tc>, window_params = [{pipeline_mode = #tpu.pipeline_mode<synchronous>, transform_indices = @transform_0, window_bounds = array<i64: 16, 16>}, {transform_indices = @transform_1, window_bounds = array<i64: 1, 8, 32>}, {transform_indices = @transform_2, window_bounds = array<i64: 1, 4, 8, 8>}]} {
    %c0 = arith.constant 0 : index
    %c0_0 = arith.constant 0 : index
    %0 = vector.load %arg2[%c0, %c0_0] : memref<16x16xbf16, #tpu.memory_space<vmem>>, vector<16x16xbf16>
    %c0_1 = arith.constant 0 : index
    %c0_2 = arith.constant 0 : index
    %c0_3 = arith.constant 0 : index
    %1 = vector.load %arg3[%c0_1, %c0_2, %c0_3] : memref<1x8x32xf32, #tpu.memory_space<vmem>>, vector<1x8x16xf32>
    %2 = vector.shape_cast %1 : vector<1x8x16xf32> to vector<8x16xf32>
    %3 = arith.truncf %2 : vector<8x16xf32> to vector<8x16xbf16>
    %4 = arith.extf %3 : vector<8x16xbf16> to vector<8x16xf32>
    %5 = arith.subf %2, %4 : vector<8x16xf32>
    %6 = arith.truncf %5 : vector<8x16xf32> to vector<8x16xbf16>
    %7 = arith.extf %6 : vector<8x16xbf16> to vector<8x16xf32>
    %8 = arith.subf %5, %7 : vector<8x16xf32>
    %9 = arith.truncf %8 : vector<8x16xf32> to vector<8x16xbf16>
    %cst = arith.constant dense<0.000000e+00> : vector<8x16xf32>
    %10 = tpu.matmul %3, %0, %cst {dimension_numbers = #tpu.dot_dimension_numbers<[1], [0], [0], [1], [0, 0, 1, 1], [], []>} : vector<8x16xbf16>, vector<16x16xbf16>, vector<8x16xf32> -> vector<8x16xf32>
    %cst_4 = arith.constant dense<0.000000e+00> : vector<8x16xf32>
    %11 = tpu.matmul %6, %0, %cst_4 {dimension_numbers = #tpu.dot_dimension_numbers<[1], [0], [0], [1], [0, 0, 1, 1], [], []>} : vector<8x16xbf16>, vector<16x16xbf16>, vector<8x16xf32> -> vector<8x16xf32>
    %12 = arith.addf %10, %11 : vector<8x16xf32>
    %cst_5 = arith.constant dense<0.000000e+00> : vector<8x16xf32>
    %13 = tpu.matmul %9, %0, %cst_5 {dimension_numbers = #tpu.dot_dimension_numbers<[1], [0], [0], [1], [0, 0, 1, 1], [], []>} : vector<8x16xbf16>, vector<16x16xbf16>, vector<8x16xf32> -> vector<8x16xf32>
    %14 = arith.addf %12, %13 : vector<8x16xf32>
    %15 = vector.extract_strided_slice %14 {offsets = [0, 0], sizes = [8, 8], strides = [1, 1]} : vector<8x16xf32> to vector<8x8xf32>
    %16 = vector.shape_cast %15 : vector<8x8xf32> to vector<1x1x8x8xf32>
    %c0_6 = arith.constant 0 : index
    %c0_7 = arith.constant 0 : index
    %c0_8 = arith.constant 0 : index
    %c0_9 = arith.constant 0 : index
    %17 = vector.load %arg4[%c0_6, %c0_7, %c0_8, %c0_9] : memref<1x4x8x8xf32, #tpu.memory_space<vmem>>, vector<1x1x8x8xf32>
    tpu.vector_store %arg4[%c0_6, %c0_7, %c0_8, %c0_9], %16 {strides = array<i32>} : memref<1x4x8x8xf32, #tpu.memory_space<vmem>>, vector<1x1x8x8xf32>,
    %18 = vector.extract_strided_slice %14 {offsets = [0, 8], sizes = [8, 8], strides = [1, 1]} : vector<8x16xf32> to vector<8x8xf32>
    %19 = vector.shape_cast %18 : vector<8x8xf32> to vector<1x1x8x8xf32>
    %c0_10 = arith.constant 0 : index
    %c1 = arith.constant 1 : index
    %c0_11 = arith.constant 0 : index
    %c0_12 = arith.constant 0 : index
    %20 = vector.load %arg4[%c0_10, %c1, %c0_11, %c0_12] : memref<1x4x8x8xf32, #tpu.memory_space<vmem>>, vector<1x1x8x8xf32>
    tpu.vector_store %arg4[%c0_10, %c1, %c0_11, %c0_12], %19 {strides = array<i32>} : memref<1x4x8x8xf32, #tpu.memory_space<vmem>>, vector<1x1x8x8xf32>,
    %c0_13 = arith.constant 0 : index
    %c0_14 = arith.constant 0 : index
    %c16 = arith.constant 16 : index
    %21 = vector.load %arg3[%c0_13, %c0_14, %c16] : memref<1x8x32xf32, #tpu.memory_space<vmem>>, vector<1x8x16xf32>
    %22 = vector.shape_cast %21 : vector<1x8x16xf32> to vector<8x16xf32>
    %23 = arith.truncf %22 : vector<8x16xf32> to vector<8x16xbf16>
    %24 = arith.extf %23 : vector<8x16xbf16> to vector<8x16xf32>
    %25 = arith.subf %22, %24 : vector<8x16xf32>
    %26 = arith.truncf %25 : vector<8x16xf32> to vector<8x16xbf16>
    %27 = arith.extf %26 : vector<8x16xbf16> to vector<8x16xf32>
    %28 = arith.subf %25, %27 : vector<8x16xf32>
    %29 = arith.truncf %28 : vector<8x16xf32> to vector<8x16xbf16>
    %cst_15 = arith.constant dense<0.000000e+00> : vector<8x16xf32>
    %30 = tpu.matmul %23, %0, %cst_15 {dimension_numbers = #tpu.dot_dimension_numbers<[1], [0], [0], [1], [0, 0, 1, 1], [], []>} : vector<8x16xbf16>, vector<16x16xbf16>, vector<8x16xf32> -> vector<8x16xf32>
    %cst_16 = arith.constant dense<0.000000e+00> : vector<8x16xf32>
    %31 = tpu.matmul %26, %0, %cst_16 {dimension_numbers = #tpu.dot_dimension_numbers<[1], [0], [0], [1], [0, 0, 1, 1], [], []>} : vector<8x16xbf16>, vector<16x16xbf16>, vector<8x16xf32> -> vector<8x16xf32>
    %32 = arith.addf %30, %31 : vector<8x16xf32>
    %cst_17 = arith.constant dense<0.000000e+00> : vector<8x16xf32>
    %33 = tpu.matmul %29, %0, %cst_17 {dimension_numbers = #tpu.dot_dimension_numbers<[1], [0], [0], [1], [0, 0, 1, 1], [], []>} : vector<8x16xbf16>, vector<16x16xbf16>, vector<8x16xf32> -> vector<8x16xf32>
    %34 = arith.addf %32, %33 : vector<8x16xf32>
    %35 = vector.extract_strided_slice %34 {offsets = [0, 0], sizes = [8, 8], strides = [1, 1]} : vector<8x16xf32> to vector<8x8xf32>
    %36 = vector.shape_cast %35 : vector<8x8xf32> to vector<1x1x8x8xf32>
    %c0_18 = arith.constant 0 : index
    %c2 = arith.constant 2 : index
    %c0_19 = arith.constant 0 : index
    %c0_20 = arith.constant 0 : index
    %37 = vector.load %arg4[%c0_18, %c2, %c0_19, %c0_20] : memref<1x4x8x8xf32, #tpu.memory_space<vmem>>, vector<1x1x8x8xf32>
    tpu.vector_store %arg4[%c0_18, %c2, %c0_19, %c0_20], %36 {strides = array<i32>} : memref<1x4x8x8xf32, #tpu.memory_space<vmem>>, vector<1x1x8x8xf32>,
    %38 = vector.extract_strided_slice %34 {offsets = [0, 8], sizes = [8, 8], strides = [1, 1]} : vector<8x16xf32> to vector<8x8xf32>
    %39 = vector.shape_cast %38 : vector<8x8xf32> to vector<1x1x8x8xf32>
    %c0_21 = arith.constant 0 : index
    %c3 = arith.constant 3 : index
    %c0_22 = arith.constant 0 : index
    %c0_23 = arith.constant 0 : index
    %40 = vector.load %arg4[%c0_21, %c3, %c0_22, %c0_23] : memref<1x4x8x8xf32, #tpu.memory_space<vmem>>, vector<1x1x8x8xf32>
    tpu.vector_store %arg4[%c0_21, %c3, %c0_22, %c0_23], %39 {strides = array<i32>} : memref<1x4x8x8xf32, #tpu.memory_space<vmem>>, vector<1x1x8x8xf32>,
    return
  }
  func.func @transform_0(%arg0: i32, %arg1: i32) -> (i32, i32) {
    %c0_i32 = arith.constant 0 : i32
    %c0_i32_0 = arith.constant 0 : i32
    %c0_i32_1 = arith.constant 0 : i32
    return %c0_i32, %c0_i32_0 : i32, i32
  }
  func.func @transform_1(%arg0: i32, %arg1: i32) -> (i32, i32, i32) {
    %c0_i32 = arith.constant 0 : i32
    %c0_i32_0 = arith.constant 0 : i32
    return %arg0, %arg1, %c0_i32 : i32, i32, i32
  }
  func.func @transform_2(%arg0: i32, %arg1: i32) -> (i32, i32, i32, i32) {
    %c0_i32 = arith.constant 0 : i32
    %c0_i32_0 = arith.constant 0 : i32
    %c0_i32_1 = arith.constant 0 : i32
    return %arg0, %c0_i32, %arg1, %c0_i32_0 : i32, i32, i32, i32
  }
}

</mosaic_0001>

<bundles_post_ra>
// kernel: psi_forward.1
= control target key start
LH: loop header
LB: loop body
LE: loop exit
PB: predicated region body
PF: predicated region fallthrough
CT: control target
= control target key end

     0   :  { %s822_s9 = smov 0   ;;  %s824_s10 = smov 0   ;;  %s936_s0 = inlined_call_operand.vmem [shape: bf16[16,16], index: 0, kind: input, shape index: {}]   ;;  %s937_s1 = inlined_call_operand.vmem [shape: f32[2,32,32], index: 1, kind: input, shape index: {}]   ;;  %s938_s2 = inlined_call_operand.vmem [shape: f32[2,4,32,8], index: 2, kind: output, shape index: {}]  }
   0x1   :  { %s826_s11 = smov 0   ;;  %s828_s12 = smov 0  }
   0x2   :  { %s830_s13 = smov 0   ;;  %s832_s14 = smov 0  }
   0x3   :  { %s834_s15 = smov 0  }
   0x4 LB: > { %s21_s16 = sadd.s32 1, %s793_s13  ;;  %s24_s17 = sadd.s32 1, %s797_s14  ;;  %s801_s15 = sphi %s834_s15, %s12_s15   ;;  %s797_s14 = sphi %s832_s14, %s945_s14   ;;  %s793_s13 = sphi %s830_s13, %s944_s13   ;;  %s789_s12 = sphi %s828_s12, %s943_s12   ;;  %s785_s11 = sphi %s826_s11, %s942_s11   ;;  %s781_s10 = sphi %s824_s10, %s941_s10   ;;  %s777_s9 = sphi %s822_s9, %s940_s9  }
   0x5   : > { %p22_p0 = scmp.ge.s32.totalorder %s21_s16, 4  ;;  %s599_s18 = sadd.s32 4294967295, %s801_s15  }
   0x6   : > { %p92_p1 = scmp.ne.s32.totalorder %s781_s10, %s777_s9  ;;  %p93_p2 = scmp.eq.s32.totalorder %s599_s18, 7 }
   0x7   : > { %s947_s16 = smov (%p22_p0, %s21_s16), 0  ;;  %s949_s17 = smov (!%p22_p0, %s24_s17), %s797_s14 }
   0x8   : > { %s78_s19 = ssub.s32 %s793_s13, %s947_s16  ;;  %p26_p3 = scmp.ge.s32.totalorder %s949_s17, 2 }
   0x9   : > { %p603_p4 = scmp.ge.s32.totalorder %s801_s15, 1  ;;  %p868_p5 = por %p93_p2, %p92_p1 }
   0xa   : > { %p131_p6 = scmp.lt.s32.totalorder %s801_s15, 9  ;;  %s951_s17 = smov (%p26_p3, %s949_s17), 0 }
   0xb   : > { %s77_s21 = ssub.s32 %s797_s14, %s951_s17  ;;  %s82_s23 = sadd.s32 1, %s781_s10 }
   0xc   : > { %p132_p7 = pnand %p603_p4, %p131_p6  ;;  %s79_s22 = sor.u32 %s78_s19, %s77_s21 }
   0xd   : > { %p80_p8 = scmp.eq.s32.totalorder %s79_s22, 0  ;;  %p155_p9 = scmp.lt.s32.totalorder (!%p132_p7), %s789_s12, 1  ;;  %v746_v0 = vld [vmem:[%s936_s0] sm:$0xff] (!%p132_p7)   ;;  %v803_v1 = vmov (!%p132_p7), 0.0   ;;  %vm804_vm0 = vmmov (!%p132_p7), 0   ;;  %vm180_vm1 = vcmask (!%p132_p7), 130048  }
   0xe   : > { %135 = sbr.rel (%p132_p7) target bundleno = 511 (0x1ff), region = 28  ;;  %p157_p10 = scmp.lt.s32.totalorder (!%p132_p7), %s785_s11, 3  ;;  %634 = vmatprep.subr.bf16.mxu0 (!%p132_p7), %v803_v1  ;;  %652 = vmatprep.subr.bf16.mxu1 (!%p132_p7), %v803_v1  ;;  %vm311_vm2 = vcmask (!%p132_p7), 64512  }
   0xf   : > { %s879_s24 = scalar_select %p80_p8, %s781_s10, %s82_s23  }
  0x10   : > { %635 = vmatpush3.bf16.msra.mxu0 (!%p132_p7), %v746_v0  ;;  %636 = vmatprep.mubr.msk.bf16.mxu0 (!%p132_p7), %vm804_vm0, %v803_v1  ;;  %s805_s7 = smov (!%p132_p7), 112   ;;  %s152_s8 = sand.u32 (!%p132_p7), 1, %s777_s9  }
  0x11   : > { %640 = vmatprep.subr.bf16.mxu0 (!%p132_p7), %v803_v1  ;;  %653 = vmatpush3.bf16.msra.mxu1 (!%p132_p7), %v746_v0  ;;  %s604_s18 = sshll.u32 (!%p132_p7), %s152_s8, 5  ;;  %s806_s21 = smov (!%p132_p7), 120  }
  0x12   : > { %654 = vmatprep.mubr.msk.bf16.mxu1 (!%p132_p7), %vm804_vm0, %v803_v1  ;;  %658 = vmatprep.subr.bf16.mxu1 (!%p132_p7), %v803_v1  ;;  %s154_s19 = scalar_lea.vmem (!%p132_p7), [#allocation2], %s604_s18 }
  0x15   : > { %s156_s27 = scalar_select %p155_p9, %s789_s12, 1 }
  0x16   : > { %s158_s28 = scalar_select %p157_p10, %s785_s11, 3 }
  0x17   : > { %s605_s29 = sshll.u32 %s156_s27, 2  ;;  %s618_s9 = sshll.u32 (%p868_p5), %s789_s12, 4 }
  0x18   : > { %s160_s30 = sadd.s32 %s605_s29, %s158_s28  ;;  %s482_s22 = sadd.s32 (%p868_p5), %s785_s11, %s618_s9 }
  0x19   : > { %s606_s3 = sshll.u32 %s160_s30, 3  ;;  %s619_s23 = sshll.u32 (%p868_p5), %s482_s22, 3 }
  0x1a   : > { %s162_s6 = scalar_lea.vmem %s937_s1, %s606_s3  ;;  %s484_s27 = scalar_lea.vmem (%p868_p5), %s938_s2, %s619_s23 }
  0x1b   : > { %v319_v2 = vld [vmem:[%s162_s6] sm:$0xff] }
  0x1c   : > { %v320_v3 = vpack.c.bf16 %v319_v2, %v319_v2 }
  0x1e   : > { %v321_v4 = vunpack.c.l.bf16 %v320_v3 }
  0x20   : > { %v322_v5 = vsub.f32 %v319_v2, %v321_v4 }
  0x22   : > { %v323_v6 = vpack.c.bf16 %v322_v5, %v322_v5 }
  0x24   : > { %328 = vrot.lane.b32.xlu0 %v323_v6, %s805_s7  ;;  %v324_v7 = vunpack.c.l.bf16 %v323_v6  ;;  %637 = vmatmul.mubr.msk.bf16.vlgmr.msra.gmra.mrb[0].mxu0 %vm180_vm1, %v323_v6 }
  0x25   : > { %641 = vmatpush3.bf16.msra.mxu0 %v746_v0  ;;  %642 = vmatprep.mubr.msk.bf16.mxu0 %vm804_vm0, %v803_v1 }
  0x26   : > { %v325_v8 = vsub.f32 %v322_v5, %v324_v7  ;;  %646 = vmatprep.subr.bf16.mxu0 %v803_v1 }
  0x28   : > { %374 = vrot.lane.b32.xlu0 %v320_v3, %s805_s7  ;;  %v326_v9 = vpack.c.bf16 %v325_v8, %v325_v8 }
  0x2a   : > { %420 = vrot.lane.b32.xlu1 %v326_v9, %s805_s7 }
  0x30   : > { %643 = vmatmul.mubr.msk.bf16.vlgmr.msra.gmra.mrb[0].mxu0 %vm180_vm1, %v320_v3 }
  0x31   : > { %647 = vmatpush3.bf16.msra.mxu0 %v746_v0  ;;  %648 = vmatprep.mubr.msk.bf16.mxu0 %vm804_vm0, %v803_v1 }
  0x3c   : > { %649 = vmatmul.mubr.msk.bf16.vlgmr.msra.gmra.mrb[0].mxu0 %vm180_vm1, %v326_v9 }
  0x96   : > { %v329_v10 = vpop.permute.xlu0 %328 }
  0x97   : > { %655 = vmatmul.mubr.msk.bf16.vlgmr.msra.gmra.mrb[0].mxu1 %vm180_vm1, %v329_v10 }
  0x98   : > { %659 = vmatpush3.bf16.msra.mxu1 %v746_v0  ;;  %660 = vmatprep.mubr.msk.bf16.mxu1 %vm804_vm0, %v803_v1 }
  0x99   : > { %664 = vmatprep.subr.bf16.mxu1 %v803_v1 }
  0x9a   : > { %v375_v11 = vpop.permute.xlu0 %374 }
  0x9c   : > { %v421_v12 = vpop.permute.xlu1 %420 }
  0xa3   : > { %661 = vmatmul.mubr.msk.bf16.vlgmr.msra.gmra.mrb[0].mxu1 %vm180_vm1, %v375_v11 }
  0xa4   : > { %665 = vmatpush3.bf16.msra.mxu1 %v746_v0  ;;  %666 = vmatprep.mubr.msk.bf16.mxu1 %vm804_vm0, %v803_v1 }
  0xaf   : > { %667 = vmatmul.mubr.msk.bf16.vlgmr.msra.gmra.mrb[0].mxu1 %vm180_vm1, %v421_v12 }
 0x10f   : > { %v304_v13 = vpop.f32.mrb[0].mxu0 }
 0x110   : > { %312 = vst.msk [vmem:[%s154_s19] sm:$0xff] %vm311_vm2, %v304_v13  ;;  %v650_v14 = vpop.f32.mrb[1].mxu0  ;;  %314 = vrot.lane.b32.xlu1 %v304_v13, %s806_s21 }
 0x111   : > { %v307_v15 = vpop.f32.mrb[2].mxu0 }
 0x112   : > { %v651_v16 = vpop.f32.mrb[3].mxu0 }
 0x117   : > { %v518_v23 = vld [vmem:[%s154_s19] sm:$0xff] (%p868_p5) }
 0x118   : > { %519 = vst [vmem:[%s484_s27] sm:$0xff] (%p868_p5), %v518_v23 }
 0x182   : > { %v459_v17 = vpop.f32.mrb[0].mxu1  ;;  %v315_v18 = vpop.permute.xlu1 %314 }
 0x183   : > { %615 = vst.msk [vmem:[%s154_s19 + $0x10] sm:$0xff] %vm311_vm2, %v459_v17  ;;  %469 = vrot.lane.b32.xlu0 %v459_v17, %s806_s21  ;;  %v668_v19 = vpop.f32.mrb[1].mxu1  ;;  %611 = vst.msk [vmem:[%s154_s19 + $0x8] sm:$0xff] %vm311_vm2, %v315_v18 }
 0x184   : > { %v462_v20 = vpop.f32.mrb[2].mxu1 }
 0x185   : > { %v669_v21 = vpop.f32.mrb[3].mxu1 }
 0x18a   : > { %v520_v24 = vld [vmem:[%s154_s19 + $0x8] sm:$0xff] (%p868_p5)  ;;  %v522_v25 = vld [vmem:[%s154_s19 + $0x10] sm:$0xff] (%p868_p5) }
 0x18b   : > { %521 = vst [vmem:[%s484_s27 + $0x20] sm:$0xff] (%p868_p5), %v520_v24  ;;  %523 = vst [vmem:[%s484_s27 + $0x40] sm:$0xff] (%p868_p5), %v522_v25 }
 0x1f0   : > { %480 = sbr.rel (!%p868_p5) target bundleno = 511 (0x1ff), region = 32 }
 0x1f5   : > { %v470_v22 = vpop.permute.xlu0 %469 }
 0x1f6   : > { %616 = vst.msk [vmem:[%s154_s19 + $0x18] sm:$0xff] %vm311_vm2, %v470_v22 }
 0x1fd   : > { %v524_v26 = vld [vmem:[%s154_s19 + $0x18] sm:$0xff] }
 0x1fe   : > { %525 = vst [vmem:[%s484_s27 + $0x60] sm:$0xff] %v524_v26 }
 0x1ff PF: > { %s12_s15 = sadd.s32 1, %s801_s15   ;;  %s940_s9 = smov %s781_s10 }
 0x200   : > { %p9_p11 = scmp.ge.s32.totalorder %s12_s15, 10   ;;  %s941_s10 = smov %s879_s24 }
 0x201   : > { %s942_s11 = smov %s793_s13  ;;  %s943_s12 = smov %s797_s14 }
 0x202   : > { %s944_s13 = smov %s947_s16  ;;  %s945_s14 = smov %s951_s17 }
 0x203   :  { %11 = sbr.rel (!%p9_p11) target bundleno = 4 (0x4), region = 99 }

</bundles_post_ra>
